<compile_context>
chip_gen: v5e
topology: v5e:2x2
jax: 0.10.0
libtpu: 0.0.40
codegen_flags: <defaults>
</compile_context>

<pallas_src>
import functools

import jax
import jax.numpy as jnp
from jax.experimental import pallas as pl
from jax.experimental.pallas import tpu as pltpu

LN_EPS = 1e-5
LANE = 128


def _round_up(x, m):
    return (x + m - 1) // m * m


def _layernorm_masked(h, gamma, beta, true_dim):
    """PyTorch-style LayerNorm over the first `true_dim` lanes of a lane-padded
    (rows, d_pad) activation. Assumes padded lanes of `h` are exactly zero."""
    d_pad = h.shape[-1]
    inv_d = 1.0 / true_dim
    mu = jnp.sum(h, axis=-1, keepdims=True) * inv_d            # padded lanes are 0
    centered = h - mu
    if true_dim != d_pad:
        lane = jax.lax.broadcasted_iota(jnp.int32, (1, d_pad), 1)
        centered = centered * (lane < true_dim).astype(h.dtype)
    var = jnp.sum(centered * centered, axis=-1, keepdims=True) * inv_d
    return centered * jax.lax.rsqrt(var + LN_EPS) * gamma + beta


def _mlp_kernel(x_ref,
                w1_ref, b1_ref, g1_ref, be1_ref,
                w2_ref, b2_ref, g2_ref, be2_ref,
                w3_ref, b3_ref,
                o_ref,
                *, d_h1, d_h2):
    # ---- Layer 1: one_hot(x) @ W1 + b1, one-hot built in-register ----
    # x_ref holds the pre-flattened indices replicated across their n_cat lanes
    # (padding lanes/rows = -1), so one lane-iota compare is the exact one-hot.
    idx = x_ref[...]                                           # (tile_b, d_in_pad) int32
    lane = jax.lax.broadcasted_iota(jnp.int32, idx.shape, 1)
    onehot = (idx == lane).astype(jnp.float32)
    h = jnp.dot(onehot, w1_ref[...],
                preferred_element_type=jnp.float32) + b1_ref[...]
    h = jnp.maximum(_layernorm_masked(h, g1_ref[...], be1_ref[...], d_h1), 0.0)

    # ---- Layer 2: Linear + LayerNorm + ReLU (lane-padded, MXU) ----
    h = jnp.dot(h, w2_ref[...],
                preferred_element_type=jnp.float32) + b2_ref[...]
    h = jnp.maximum(_layernorm_masked(h, g2_ref[...], be2_ref[...], d_h2), 0.0)

    # ---- Layer 3: Linear + sigmoid (lane-dense, 128-wide output store) ----
    o = jnp.dot(h, w3_ref[...],
                preferred_element_type=jnp.float32) + b3_ref[...]
    o_ref[...] = jax.nn.sigmoid(o)


def mlp_forward(x_int, params, *, n_cat=5, max_tile_b=256):
    """x_int: int32 (B, n_feat) with values in [0, n_cat). Returns (B, d_out) f32."""
    (w1, b1, g1, be1, w2, b2, g2, be2, w3, b3) = params
    B, n_feat = x_int.shape
    d_in, d_h1 = w1.shape
    d_h2 = w2.shape[1]
    d_out = w3.shape[1]
    assert d_in == n_feat * n_cat

    # Lane-pad every feature dim to a multiple of 128 with zeros (math stays
    # exact; LayerNorm reductions are masked to the true widths inside the kernel).
    dip, h1p, h2p, dop = (_round_up(d, LANE) for d in (d_in, d_h1, d_h2, d_out))
    padc = lambda a, n: jnp.pad(a, ((0, 0), (0, n - a.shape[1])))
    w1p = jnp.pad(w1, ((0, dip - d_in), (0, h1p - d_h1)))
    b1p, g1p, be1p = padc(b1, h1p), padc(g1, h1p), padc(be1, h1p)
    w2p = jnp.pad(w2, ((0, h1p - d_h1), (0, h2p - d_h2)))
    b2p, g2p, be2p = padc(b2, h2p), padc(g2, h2p), padc(be2, h2p)
    w3p = jnp.pad(w3, ((0, h2p - d_h2), (0, dop - d_out)))
    b3p = padc(b3, dop)

    # Pre-flatten the categorical indices (torch flattening order: flat index =
    # feature*n_cat + cat) and replicate each across its n_cat lanes so the
    # kernel's lane-iota compare yields the one-hot directly. Pads use -1 (never
    # matches a lane index), so padded lanes/rows produce all-zero one-hot rows.
    flat = x_int.astype(jnp.int32) + (jnp.arange(n_feat, dtype=jnp.int32) * n_cat)[None, :]
    x_exp = jnp.repeat(flat, n_cat, axis=1)                    # (B, d_in)

    # Whole batch in one grid step at small B; <=max_tile_b-row tiles otherwise.
    tile_b = min(_round_up(B, 8), max_tile_b)
    bp = _round_up(B, tile_b)
    x_exp = jnp.pad(x_exp, ((0, bp - B), (0, dip - d_in)), constant_values=-1)
    grid = (bp // tile_b,)

    const = lambda shape: pl.BlockSpec(shape, lambda i: (0, 0))
    # TODO(synk): at real layer sizes, single-buffer the constant weight blocks
    # (pipeline_mode=pl.Buffered(1)), tile K/N so big weights fit v7x's 64 MiB
    # VMEM, and cast matmul operands to bf16 on v6e/v7x (keep LN/sigmoid f32).

    kernel = functools.partial(_mlp_kernel, d_h1=d_h1, d_h2=d_h2)
    out = pl.pallas_call(
        kernel,
        out_shape=jax.ShapeDtypeStruct((bp, dop), jnp.float32),
        grid=grid,
        in_specs=[
            pl.BlockSpec((tile_b, dip), lambda i: (i, 0)),     # replicated int32 idx
            const((dip, h1p)), const((1, h1p)),                # W1, b1
            const((1, h1p)), const((1, h1p)),                  # gamma1, beta1
            const((h1p, h2p)), const((1, h2p)),                # W2, b2
            const((1, h2p)), const((1, h2p)),                  # gamma2, beta2
            const((h2p, dop)), const((1, dop)),                # W3, b3
        ],
        out_specs=pl.BlockSpec((tile_b, dop), lambda i: (i, 0)),
        compiler_params=pltpu.CompilerParams(
            dimension_semantics=("parallel",)),
    )(x_exp, w1p, b1p, g1p, be1p, w2p, b2p, g2p, be2p, w3p, b3p)
    return out[:B, :d_out]


def init_params(key, input_dim, hidden_dim, output_dim):
    """Deterministic parameter init (PyTorch-style bounds, (in, out) weights)."""
    ks = jax.random.split(key, 6)
    d_h2 = hidden_dim // 2

    def linear(kw, kb, d_in, d_out):
        bound = 1.0 / jnp.sqrt(d_in)
        w = jax.random.uniform(kw, (d_in, d_out), jnp.float32, -bound, bound)
        b = jax.random.uniform(kb, (1, d_out), jnp.float32, -bound, bound)
        return w, b

    w1, b1 = linear(ks[0], ks[1], input_dim, hidden_dim)
    w2, b2 = linear(ks[2], ks[3], hidden_dim, d_h2)
    w3, b3 = linear(ks[4], ks[5], d_h2, output_dim)
    # LayerNorm affine params: PyTorch default init (ones / zeros).
    g1, be1 = jnp.ones((1, hidden_dim), jnp.float32), jnp.zeros((1, hidden_dim), jnp.float32)
    g2, be2 = jnp.ones((1, d_h2), jnp.float32), jnp.zeros((1, d_h2), jnp.float32)
    return (w1, b1, g1, be1, w2, b2, g2, be2, w3, b3)


def reference_forward(x_int, params):
    """Pure-JAX reference mirroring the PyTorch forward."""
    (w1, b1, g1, be1, w2, b2, g2, be2, w3, b3) = params
    x = jax.nn.one_hot(x_int, 5, dtype=jnp.float32).reshape(x_int.shape[0], -1)

    def ln(h, g, b):
        mu = h.mean(-1, keepdims=True)
        var = ((h - mu) ** 2).mean(-1, keepdims=True)
        return (h - mu) / jnp.sqrt(var + LN_EPS) * g + b

    h = jnp.maximum(ln(x @ w1 + b1, g1, be1), 0.0)
    h = jnp.maximum(ln(h @ w2 + b2, g2, be2), 0.0)
    return jax.nn.sigmoid(h @ w3 + b3)


if __name__ == "__main__":
    key = jax.random.PRNGKey(0)
    k_x, k_p = jax.random.split(key)

    # Small, MLP-consistent shapes: 16 samples, 8 categorical features each
    # (5 categories) -> input_dim = 8 * 5 = 40, hidden_dim = 32, output_dim = 4.
    batch, n_feat, n_cat = 16, 8, 5
    input_dim, hidden_dim, output_dim = n_feat * n_cat, 32, 4

    x_int = jax.random.randint(k_x, (batch, n_feat), 0, n_cat, dtype=jnp.int32)
    params = init_params(k_p, input_dim, hidden_dim, output_dim)

    out = jax.block_until_ready(mlp_forward(x_int, params))

    ref = reference_forward(x_int, params)
    assert out.shape == (batch, output_dim)
    assert jnp.allclose(out, ref, atol=2e-5, rtol=2e-5), "mismatch vs reference"

    print("KERNEL_OK")
</pallas_src>

<mosaic_0001>
module attributes {stable_mosaic.version = 11 : i64} {
  func.func @_mlp_kernel(%arg0: i32, %arg1: memref<16x128xi32, #tpu.memory_space<vmem>>, %arg2: memref<128x128xf32, #tpu.memory_space<vmem>>, %arg3: memref<1x128xf32, #tpu.memory_space<vmem>>, %arg4: memref<1x128xf32, #tpu.memory_space<vmem>>, %arg5: memref<1x128xf32, #tpu.memory_space<vmem>>, %arg6: memref<128x128xf32, #tpu.memory_space<vmem>>, %arg7: memref<1x128xf32, #tpu.memory_space<vmem>>, %arg8: memref<1x128xf32, #tpu.memory_space<vmem>>, %arg9: memref<1x128xf32, #tpu.memory_space<vmem>>, %arg10: memref<128x128xf32, #tpu.memory_space<vmem>>, %arg11: memref<1x128xf32, #tpu.memory_space<vmem>>, %arg12: memref<16x128xf32, #tpu.memory_space<vmem>>) attributes {dimension_semantics = [#tpu.dimension_semantics<parallel>], iteration_bounds = array<i64: 1>, scalar_prefetch = 0 : i64, scratch_operands = 0 : i64, tpu.core_type = #tpu.core_type<tc>, window_params = [{transform_indices = @transform_0, window_bounds = array<i64: 16, 128>}, {pipeline_mode = #tpu.pipeline_mode<synchronous>, transform_indices = @transform_1, window_bounds = array<i64: 128, 128>}, {pipeline_mode = #tpu.pipeline_mode<synchronous>, transform_indices = @transform_2, window_bounds = array<i64: 1, 128>}, {pipeline_mode = #tpu.pipeline_mode<synchronous>, transform_indices = @transform_3, window_bounds = array<i64: 1, 128>}, {pipeline_mode = #tpu.pipeline_mode<synchronous>, transform_indices = @transform_4, window_bounds = array<i64: 1, 128>}, {pipeline_mode = #tpu.pipeline_mode<synchronous>, transform_indices = @transform_5, window_bounds = array<i64: 128, 128>}, {pipeline_mode = #tpu.pipeline_mode<synchronous>, transform_indices = @transform_6, window_bounds = array<i64: 1, 128>}, {pipeline_mode = #tpu.pipeline_mode<synchronous>, transform_indices = @transform_7, window_bounds = array<i64: 1, 128>}, {pipeline_mode = #tpu.pipeline_mode<synchronous>, transform_indices = @transform_8, window_bounds = array<i64: 1, 128>}, {pipeline_mode = #tpu.pipeline_mode<synchronous>, transform_indices = @transform_9, window_bounds = array<i64: 128, 128>}, {pipeline_mode = #tpu.pipeline_mode<synchronous>, transform_indices = @transform_10, window_bounds = array<i64: 1, 128>}, {transform_indices = @transform_11, window_bounds = array<i64: 16, 128>}]} {
    %c0 = arith.constant 0 : index
    %c0_0 = arith.constant 0 : index
    %0 = vector.load %arg1[%c0, %c0_0] : memref<16x128xi32, #tpu.memory_space<vmem>>, vector<16x128xi32>
    %1 = tpu.iota {dimensions = array<i32: 1>} : vector<16x128xi32>
    %2 = arith.cmpi eq, %0, %1 : vector<16x128xi32>
    %3 = arith.extui %2 : vector<16x128xi1> to vector<16x128xi32>
    %4 = arith.sitofp %3 : vector<16x128xi32> to vector<16x128xf32>
    %c0_1 = arith.constant 0 : index
    %c0_2 = arith.constant 0 : index
    %5 = vector.load %arg2[%c0_1, %c0_2] : memref<128x128xf32, #tpu.memory_space<vmem>>, vector<128x128xf32>
    %cst = arith.constant dense<0.000000e+00> : vector<16x128xf32>
    %6 = tpu.matmul %4, %5, %cst {dimension_numbers = #tpu.dot_dimension_numbers<[1], [0], [0], [1], [0, 0, 1, 1], [], []>} : vector<16x128xf32>, vector<128x128xf32>, vector<16x128xf32> -> vector<16x128xf32>
    %c0_3 = arith.constant 0 : index
    %c0_4 = arith.constant 0 : index
    %7 = vector.load %arg3[%c0_3, %c0_4] : memref<1x128xf32, #tpu.memory_space<vmem>>, vector<1x128xf32>
    %8 = vector.broadcast %7 : vector<1x128xf32> to vector<16x128xf32>
    %9 = arith.addf %6, %8 : vector<16x128xf32>
    %c0_5 = arith.constant 0 : index
    %c0_6 = arith.constant 0 : index
    %10 = vector.load %arg4[%c0_5, %c0_6] : memref<1x128xf32, #tpu.memory_space<vmem>>, vector<1x128xf32>
    %c0_7 = arith.constant 0 : index
    %c0_8 = arith.constant 0 : index
    %11 = vector.load %arg5[%c0_7, %c0_8] : memref<1x128xf32, #tpu.memory_space<vmem>>, vector<1x128xf32>
    %cst_9 = arith.constant dense<0.000000e+00> : vector<16xf32>
    %12 = vector.multi_reduction <add>, %9, %cst_9 [1] : vector<16x128xf32> to vector<16xf32>
    %13 = vector.shape_cast %12 : vector<16xf32> to vector<16x1xf32>
    %cst_10 = arith.constant 3.125000e-02 : f32
    %14 = vector.broadcast %cst_10 : f32 to vector<16x1xf32>
    %15 = arith.mulf %13, %14 : vector<16x1xf32>
    %16 = vector.broadcast %15 : vector<16x1xf32> to vector<16x128xf32>
    %17 = arith.subf %9, %16 : vector<16x128xf32>
    %18 = tpu.iota {dimensions = array<i32: 1>} : vector<1x128xi32>
    %c32_i32 = arith.constant 32 : i32
    %19 = vector.broadcast %c32_i32 : i32 to vector<1x128xi32>
    %20 = arith.cmpi slt, %18, %19 : vector<1x128xi32>
    %21 = arith.extui %20 : vector<1x128xi1> to vector<1x128xi32>
    %22 = arith.sitofp %21 : vector<1x128xi32> to vector<1x128xf32>
    %23 = vector.broadcast %22 : vector<1x128xf32> to vector<16x128xf32>
    %24 = arith.mulf %17, %23 : vector<16x128xf32>
    %25 = arith.mulf %24, %24 : vector<16x128xf32>
    %cst_11 = arith.constant dense<0.000000e+00> : vector<16xf32>
    %26 = vector.multi_reduction <add>, %25, %cst_11 [1] : vector<16x128xf32> to vector<16xf32>
    %27 = vector.shape_cast %26 : vector<16xf32> to vector<16x1xf32>
    %cst_12 = arith.constant 3.125000e-02 : f32
    %28 = vector.broadcast %cst_12 : f32 to vector<16x1xf32>
    %29 = arith.mulf %27, %28 : vector<16x1xf32>
    %cst_13 = arith.constant 9.99999974E-6 : f32
    %30 = vector.broadcast %cst_13 : f32 to vector<16x1xf32>
    %31 = arith.addf %29, %30 : vector<16x1xf32>
    %32 = math.rsqrt %31 : vector<16x1xf32>
    %33 = vector.broadcast %32 : vector<16x1xf32> to vector<16x128xf32>
    %34 = arith.mulf %24, %33 : vector<16x128xf32>
    %35 = vector.broadcast %10 : vector<1x128xf32> to vector<16x128xf32>
    %36 = arith.mulf %34, %35 : vector<16x128xf32>
    %37 = vector.broadcast %11 : vector<1x128xf32> to vector<16x128xf32>
    %38 = arith.addf %36, %37 : vector<16x128xf32>
    %cst_14 = arith.constant 0.000000e+00 : f32
    %39 = vector.broadcast %cst_14 : f32 to vector<16x128xf32>
    %40 = arith.maximumf %38, %39 : vector<16x128xf32>
    %c0_15 = arith.constant 0 : index
    %c0_16 = arith.constant 0 : index
    %41 = vector.load %arg6[%c0_15, %c0_16] : memref<128x128xf32, #tpu.memory_space<vmem>>, vector<128x128xf32>
    %cst_17 = arith.constant dense<0.000000e+00> : vector<16x128xf32>
    %42 = tpu.matmul %40, %41, %cst_17 {dimension_numbers = #tpu.dot_dimension_numbers<[1], [0], [0], [1], [0, 0, 1, 1], [], []>} : vector<16x128xf32>, vector<128x128xf32>, vector<16x128xf32> -> vector<16x128xf32>
    %c0_18 = arith.constant 0 : index
    %c0_19 = arith.constant 0 : index
    %43 = vector.load %arg7[%c0_18, %c0_19] : memref<1x128xf32, #tpu.memory_space<vmem>>, vector<1x128xf32>
    %44 = vector.broadcast %43 : vector<1x128xf32> to vector<16x128xf32>
    %45 = arith.addf %42, %44 : vector<16x128xf32>
    %c0_20 = arith.constant 0 : index
    %c0_21 = arith.constant 0 : index
    %46 = vector.load %arg8[%c0_20, %c0_21] : memref<1x128xf32, #tpu.memory_space<vmem>>, vector<1x128xf32>
    %c0_22 = arith.constant 0 : index
    %c0_23 = arith.constant 0 : index
    %47 = vector.load %arg9[%c0_22, %c0_23] : memref<1x128xf32, #tpu.memory_space<vmem>>, vector<1x128xf32>
    %cst_24 = arith.constant dense<0.000000e+00> : vector<16xf32>
    %48 = vector.multi_reduction <add>, %45, %cst_24 [1] : vector<16x128xf32> to vector<16xf32>
    %49 = vector.shape_cast %48 : vector<16xf32> to vector<16x1xf32>
    %cst_25 = arith.constant 6.250000e-02 : f32
    %50 = vector.broadcast %cst_25 : f32 to vector<16x1xf32>
    %51 = arith.mulf %49, %50 : vector<16x1xf32>
    %52 = vector.broadcast %51 : vector<16x1xf32> to vector<16x128xf32>
    %53 = arith.subf %45, %52 : vector<16x128xf32>
    %54 = tpu.iota {dimensions = array<i32: 1>} : vector<1x128xi32>
    %c16_i32 = arith.constant 16 : i32
    %55 = vector.broadcast %c16_i32 : i32 to vector<1x128xi32>
    %56 = arith.cmpi slt, %54, %55 : vector<1x128xi32>
    %57 = arith.extui %56 : vector<1x128xi1> to vector<1x128xi32>
    %58 = arith.sitofp %57 : vector<1x128xi32> to vector<1x128xf32>
    %59 = vector.broadcast %58 : vector<1x128xf32> to vector<16x128xf32>
    %60 = arith.mulf %53, %59 : vector<16x128xf32>
    %61 = arith.mulf %60, %60 : vector<16x128xf32>
    %cst_26 = arith.constant dense<0.000000e+00> : vector<16xf32>
    %62 = vector.multi_reduction <add>, %61, %cst_26 [1] : vector<16x128xf32> to vector<16xf32>
    %63 = vector.shape_cast %62 : vector<16xf32> to vector<16x1xf32>
    %cst_27 = arith.constant 6.250000e-02 : f32
    %64 = vector.broadcast %cst_27 : f32 to vector<16x1xf32>
    %65 = arith.mulf %63, %64 : vector<16x1xf32>
    %cst_28 = arith.constant 9.99999974E-6 : f32
    %66 = vector.broadcast %cst_28 : f32 to vector<16x1xf32>
    %67 = arith.addf %65, %66 : vector<16x1xf32>
    %68 = math.rsqrt %67 : vector<16x1xf32>
    %69 = vector.broadcast %68 : vector<16x1xf32> to vector<16x128xf32>
    %70 = arith.mulf %60, %69 : vector<16x128xf32>
    %71 = vector.broadcast %46 : vector<1x128xf32> to vector<16x128xf32>
    %72 = arith.mulf %70, %71 : vector<16x128xf32>
    %73 = vector.broadcast %47 : vector<1x128xf32> to vector<16x128xf32>
    %74 = arith.addf %72, %73 : vector<16x128xf32>
    %cst_29 = arith.constant 0.000000e+00 : f32
    %75 = vector.broadcast %cst_29 : f32 to vector<16x128xf32>
    %76 = arith.maximumf %74, %75 : vector<16x128xf32>
    %c0_30 = arith.constant 0 : index
    %c0_31 = arith.constant 0 : index
    %77 = vector.load %arg10[%c0_30, %c0_31] : memref<128x128xf32, #tpu.memory_space<vmem>>, vector<128x128xf32>
    %cst_32 = arith.constant dense<0.000000e+00> : vector<16x128xf32>
    %78 = tpu.matmul %76, %77, %cst_32 {dimension_numbers = #tpu.dot_dimension_numbers<[1], [0], [0], [1], [0, 0, 1, 1], [], []>} : vector<16x128xf32>, vector<128x128xf32>, vector<16x128xf32> -> vector<16x128xf32>
    %c0_33 = arith.constant 0 : index
    %c0_34 = arith.constant 0 : index
    %79 = vector.load %arg11[%c0_33, %c0_34] : memref<1x128xf32, #tpu.memory_space<vmem>>, vector<1x128xf32>
    %80 = vector.broadcast %79 : vector<1x128xf32> to vector<16x128xf32>
    %81 = arith.addf %78, %80 : vector<16x128xf32>
    %82 = arith.negf %81 : vector<16x128xf32>
    %83 = math.exp %82 : vector<16x128xf32>
    %cst_35 = arith.constant 1.000000e+00 : f32
    %84 = vector.broadcast %cst_35 : f32 to vector<16x128xf32>
    %85 = arith.addf %84, %83 : vector<16x128xf32>
    %86 = arith.divf %84, %85 : vector<16x128xf32>
    %c0_36 = arith.constant 0 : index
    %c0_37 = arith.constant 0 : index
    %87 = vector.load %arg12[%c0_36, %c0_37] : memref<16x128xf32, #tpu.memory_space<vmem>>, vector<16x128xf32>
    tpu.vector_store %arg12[%c0_36, %c0_37], %86 {strides = array<i32>} : memref<16x128xf32, #tpu.memory_space<vmem>>, vector<16x128xf32>,
    return
  }
  func.func @transform_0(%arg0: i32) -> (i32, i32) {
    %c0_i32 = arith.constant 0 : i32
    %c0_i32_0 = arith.constant 0 : i32
    return %arg0, %c0_i32 : i32, i32
  }
  func.func @transform_1(%arg0: i32) -> (i32, i32) {
    %c0_i32 = arith.constant 0 : i32
    %c0_i32_0 = arith.constant 0 : i32
    %c0_i32_1 = arith.constant 0 : i32
    return %c0_i32, %c0_i32_0 : i32, i32
  }
  func.func @transform_2(%arg0: i32) -> (i32, i32) {
    %c0_i32 = arith.constant 0 : i32
    %c0_i32_0 = arith.constant 0 : i32
    %c0_i32_1 = arith.constant 0 : i32
    return %c0_i32, %c0_i32_0 : i32, i32
  }
  func.func @transform_3(%arg0: i32) -> (i32, i32) {
    %c0_i32 = arith.constant 0 : i32
    %c0_i32_0 = arith.constant 0 : i32
    %c0_i32_1 = arith.constant 0 : i32
    return %c0_i32, %c0_i32_0 : i32, i32
  }
  func.func @transform_4(%arg0: i32) -> (i32, i32) {
    %c0_i32 = arith.constant 0 : i32
    %c0_i32_0 = arith.constant 0 : i32
    %c0_i32_1 = arith.constant 0 : i32
    return %c0_i32, %c0_i32_0 : i32, i32
  }
  func.func @transform_5(%arg0: i32) -> (i32, i32) {
    %c0_i32 = arith.constant 0 : i32
    %c0_i32_0 = arith.constant 0 : i32
    %c0_i32_1 = arith.constant 0 : i32
    return %c0_i32, %c0_i32_0 : i32, i32
  }
  func.func @transform_6(%arg0: i32) -> (i32, i32) {
    %c0_i32 = arith.constant 0 : i32
    %c0_i32_0 = arith.constant 0 : i32
    %c0_i32_1 = arith.constant 0 : i32
    return %c0_i32, %c0_i32_0 : i32, i32
  }
  func.func @transform_7(%arg0: i32) -> (i32, i32) {
    %c0_i32 = arith.constant 0 : i32
    %c0_i32_0 = arith.constant 0 : i32
    %c0_i32_1 = arith.constant 0 : i32
    return %c0_i32, %c0_i32_0 : i32, i32
  }
  func.func @transform_8(%arg0: i32) -> (i32, i32) {
    %c0_i32 = arith.constant 0 : i32
    %c0_i32_0 = arith.constant 0 : i32
    %c0_i32_1 = arith.constant 0 : i32
    return %c0_i32, %c0_i32_0 : i32, i32
  }
  func.func @transform_9(%arg0: i32) -> (i32, i32) {
    %c0_i32 = arith.constant 0 : i32
    %c0_i32_0 = arith.constant 0 : i32
    %c0_i32_1 = arith.constant 0 : i32
    return %c0_i32, %c0_i32_0 : i32, i32
  }
  func.func @transform_10(%arg0: i32) -> (i32, i32) {
    %c0_i32 = arith.constant 0 : i32
    %c0_i32_0 = arith.constant 0 : i32
    %c0_i32_1 = arith.constant 0 : i32
    return %c0_i32, %c0_i32_0 : i32, i32
  }
  func.func @transform_11(%arg0: i32) -> (i32, i32) {
    %c0_i32 = arith.constant 0 : i32
    %c0_i32_0 = arith.constant 0 : i32
    return %arg0, %c0_i32 : i32, i32
  }
}

</mosaic_0001>

<bundles_post_ra>
// kernel: tpu_custom_call.1
= control target key start
LH: loop header
LB: loop body
LE: loop exit
PB: predicated region body
PF: predicated region fallthrough
CT: control target
= control target key end

     0   :  { %16 = vsyncpa [#allocation3], 0  ;;  %s742_s0 = inlined_call_operand.hbm [shape: s32[16,128], index: 0, kind: input, shape index: {}]   ;;  %s743_s1 = inlined_call_operand.hbm [shape: f32[128,128], index: 1, kind: input, shape index: {}]   ;;  %s744_s2 = inlined_call_operand.vmem [shape: f32[1,128], index: 2, kind: input, shape index: {}]   ;;  %s745_s3 = inlined_call_operand.vmem [shape: f32[1,128], index: 3, kind: input, shape index: {}]   ;;  %s746_s4 = inlined_call_operand.vmem [shape: f32[1,128], index: 4, kind: input, shape index: {}]   ;;  %s747_s5 = inlined_call_operand.hbm [shape: f32[128,128], index: 5, kind: input, shape index: {}]   ;;  %s748_s6 = inlined_call_operand.vmem [shape: f32[1,128], index: 6, kind: input, shape index: {}]   ;;  %s749_s7 = inlined_call_operand.vmem [shape: f32[1,128], index: 7, kind: input, shape index: {}]   ;;  %s750_s8 = inlined_call_operand.vmem [shape: f32[1,128], index: 8, kind: input, shape index: {}]   ;;  %s751_s9 = inlined_call_operand.hbm [shape: f32[128,128], index: 9, kind: input, shape index: {}]   ;;  %s752_s10 = inlined_call_operand.vmem [shape: f32[1,128], index: 10, kind: input, shape index: {}]   ;;  %s753_s11 = inlined_call_operand.hbm [shape: f32[16,128], index: 11, kind: output, shape index: {}]  }
   0x1   :  { %17 = vsyncpa [#allocation6], 0 }
   0x2   :  { %18 = vsyncpa [#allocation9], 0 }
   0x3   :  { %19 = vsyncpa [#allocation4], 0  ;;  %s37_s19 = sshll.u32 %s743_s1, 4  ;;  %s604_s20 = smov [#allocation5]   ;;  %s38_s19 = int_to_ptr.hbm [resolvable:$true] %s37_s19 }
   0x4   :  { %s39_s21 = sshll.u32 %s604_s20, 4  ;;  %s24_s24 = sshll.u32 %s742_s0, 4  ;;  %s40_s21 = int_to_ptr.vmem [resolvable:$true] %s39_s21  ;;  %s25_s24 = int_to_ptr.hbm [resolvable:$true] %s24_s24 }
   0x5   :  { %s605_s25 = smov 128   ;;  %s606_s26 = smov 8  }
   0x6   :  { %45 = dma.hbm_to_vmem [thread:$0]  %s38_s19, 2048, %s40_s21, [#allocation6], %s605_s25, %s605_s25, %s606_s26  }
   0x7   :  { %s607_s27 = smov [#allocation2]   ;;  %s56_s1 = sshll.u32 %s747_s5, 4  ;;  %s57_s1 = int_to_ptr.hbm [resolvable:$true] %s56_s1 }
   0x8   :  { %s26_s28 = sshll.u32 %s607_s27, 4  ;;  %s75_s13 = sshll.u32 %s751_s9, 4  ;;  %s27_s28 = int_to_ptr.vmem [resolvable:$true] %s26_s28  ;;  %s76_s13 = int_to_ptr.hbm [resolvable:$true] %s75_s13 }
   0x9   :  { %32 = dma.hbm_to_vmem [thread:$0]  %s25_s24, 256, %s27_s28, [#allocation3], %s605_s25, %s605_s25, %s606_s26  }
   0xa   :  { %s608_s14 = smov [#allocation7]   ;;  %s609_s16 = smov [#allocation8]  }
   0xb   :  { %s58_s15 = sshll.u32 %s608_s14, 4  ;;  %s77_s5 = sshll.u32 %s609_s16, 4  ;;  %s59_s15 = int_to_ptr.vmem [resolvable:$true] %s58_s15  ;;  %s78_s5 = int_to_ptr.vmem [resolvable:$true] %s77_s5 }
   0xc   :  { %64 = dma.hbm_to_vmem [thread:$0]  %s57_s1, 2048, %s59_s15, [#allocation6], %s605_s25, %s605_s25, %s606_s26  }
   0xd   :  { %83 = dma.hbm_to_vmem [thread:$0]  %s76_s13, 2048, %s78_s5, [#allocation9], %s605_s25, %s605_s25, %s606_s26  }
   0xe   :  { %596 = dma.done.wait [#allocation3], 256  }
   0xf   :  { %597 = vsyncadd [#allocation3], 4294967040 }
  0x10   :  { %598 = dma.done.wait [#allocation6], 4096  }
  0x11   :  { %599 = vsyncadd [#allocation6], 4294963200 }
  0x12   :  { %600 = dma.done.wait [#allocation9], 2048  }
  0x13   :  { %601 = vsyncadd [#allocation9], 4294965248  ;;  %v127_v0 = vld [vmem:[#allocation5 + $0x78] sm:$0xff]  ;;  %v126_v1 = vld [vmem:[#allocation5 + $0x70] sm:$0xff]  ;;  %v104_v12 = vlaneseq  ;;  %v610_v20 = vmov 1.0   ;;  %v611_v29 = vmov 0.0  }
  0x14   :  { %132 = vmatpush.msra.mxu0 %v127_v0  ;;  %428 = vmatpush.msra.mxu3 %v127_v0  ;;  %v125_v2 = vld [vmem:[#allocation5 + $0x68] sm:$0xff]  ;;  %v124_v3 = vld [vmem:[#allocation5 + $0x60] sm:$0xff]  ;;  %v123_v4 = vld [vmem:[#allocation5 + $0x58] sm:$0xff]  ;;  %s405_s29 = sshll.u32 %s753_s11, 4  ;;  %s406_s29 = int_to_ptr.hbm [resolvable:$true] %s405_s29 }
  0x15   :  { %v122_v5 = vld [vmem:[#allocation5 + $0x50] sm:$0xff]  ;;  %v121_v6 = vld [vmem:[#allocation5 + $0x48] sm:$0xff]  ;;  %v120_v7 = vld [vmem:[#allocation5 + $0x40] sm:$0xff]  ;;  %v697_v15 = vand.u32 127, %v104_v12 }
  0x16   :  { %133 = vmatpush.msra.mxu0 %v126_v1  ;;  %429 = vmatpush.msra.mxu3 %v126_v1  ;;  %v119_v8 = vld [vmem:[#allocation5 + $0x38] sm:$0xff]  ;;  %v118_v9 = vld [vmem:[#allocation5 + $0x30] sm:$0xff]  ;;  %v117_v10 = vld [vmem:[#allocation5 + $0x28] sm:$0xff] }
  0x17   :  { %v116_v11 = vld [vmem:[#allocation5 + $0x20] sm:$0xff]  ;;  %v115_v13 = vld [vmem:[#allocation5 + $0x18] sm:$0xff]  ;;  %v114_v14 = vld [vmem:[#allocation5 + $0x10] sm:$0xff]  ;;  %vm165_vm2 = vcmp.lt.s32.totalorder %v697_v15, 32  ;;  %vm267_vm9 = vcmp.lt.s32.totalorder %v697_v15, 16 }
  0x18   :  { %134 = vmatpush.msra.mxu0 %v125_v2  ;;  %430 = vmatpush.msra.mxu3 %v125_v2  ;;  %v113_v16 = vld [vmem:[#allocation5 + $0x8] sm:$0xff]  ;;  %v102_v17 = vld [vmem:[#allocation2] sm:$0xff]  ;;  %v103_v18 = vld [vmem:[#allocation2 + $0x8] sm:$0xff]  ;;  %v424_v30 = vsel %vm165_vm2, 1.0, %v611_v29 }
  0x19   :  { %v112_v19 = vld [vmem:[#allocation5] sm:$0xff]  ;;  %vm106_vm0 = vcmp.eq.s32.totalorder %v102_v17, %v697_v15  ;;  %vm107_vm1 = vcmp.eq.s32.totalorder %v103_v18, %v697_v15  ;;  %v453_v21 = vld [vmem:[%s744_s2] ss:$0 sm:$0xff]  ;;  %v229_v26 = vld [vmem:[#allocation7 + $0x78] sm:$0xff] }
  0x1a   :  { %135 = vmatpush.msra.mxu0 %v124_v3  ;;  %431 = vmatpush.msra.mxu3 %v124_v3  ;;  %v228_v39 = vld [vmem:[#allocation7 + $0x70] sm:$0xff]  ;;  %v227_v40 = vld [vmem:[#allocation7 + $0x68] sm:$0xff]  ;;  %v226_v41 = vld [vmem:[#allocation7 + $0x60] sm:$0xff] }
  0x1b   :  { %234 = vmatpush.msra.mxu1 %v229_v26  ;;  %v225_v42 = vld [vmem:[#allocation7 + $0x58] sm:$0xff]  ;;  %v224_v43 = vld [vmem:[#allocation7 + $0x50] sm:$0xff]  ;;  %v223_v44 = vld [vmem:[#allocation7 + $0x48] sm:$0xff] }
  0x1c   :  { %136 = vmatpush.msra.mxu0 %v123_v4  ;;  %432 = vmatpush.msra.mxu3 %v123_v4  ;;  %v222_v45 = vld [vmem:[#allocation7 + $0x40] sm:$0xff]  ;;  %v221_v46 = vld [vmem:[#allocation7 + $0x38] sm:$0xff]  ;;  %v220_v47 = vld [vmem:[#allocation7 + $0x30] sm:$0xff] }
  0x1d   :  { %235 = vmatpush.msra.mxu1 %v228_v39  ;;  %v219_v48 = vld [vmem:[#allocation7 + $0x28] sm:$0xff]  ;;  %v218_v49 = vld [vmem:[#allocation7 + $0x20] sm:$0xff]  ;;  %v217_v50 = vld [vmem:[#allocation7 + $0x18] sm:$0xff] }
  0x1e   :  { %137 = vmatpush.msra.mxu0 %v122_v5  ;;  %433 = vmatpush.msra.mxu3 %v122_v5  ;;  %v216_v51 = vld [vmem:[#allocation7 + $0x10] sm:$0xff]  ;;  %v215_v52 = vld [vmem:[#allocation7 + $0x8] sm:$0xff]  ;;  %v214_v53 = vld [vmem:[#allocation7] sm:$0xff] }
  0x1f   :  { %236 = vmatpush.msra.mxu1 %v227_v40  ;;  %v454_v4 = vld [vmem:[%s745_s3] ss:$0 sm:$0xff]  ;;  %v331_v26 = vld [vmem:[#allocation8 + $0x78] sm:$0xff]  ;;  %v329_v15 = vld [vmem:[#allocation8 + $0x68] sm:$0xff] }
  0x20   :  { %138 = vmatpush.msra.mxu0 %v121_v6  ;;  %434 = vmatpush.msra.mxu3 %v121_v6  ;;  %v330_v39 = vld [vmem:[#allocation8 + $0x70] sm:$0xff]  ;;  %v328_v40 = vld [vmem:[#allocation8 + $0x60] sm:$0xff] }
  0x21   :  { %237 = vmatpush.msra.mxu1 %v226_v41  ;;  %336 = vmatpush.msra.mxu2 %v331_v26  ;;  %v326_v41 = vld [vmem:[#allocation8 + $0x50] sm:$0xff] }
  0x22   :  { %139 = vmatpush.msra.mxu0 %v120_v7  ;;  %435 = vmatpush.msra.mxu3 %v120_v7 }
  0x23   :  { %238 = vmatpush.msra.mxu1 %v225_v42  ;;  %337 = vmatpush.msra.mxu2 %v330_v39  ;;  %v325_v42 = vld [vmem:[#allocation8 + $0x48] sm:$0xff] }
  0x24   :  { %140 = vmatpush.msra.mxu0 %v119_v8  ;;  %436 = vmatpush.msra.mxu3 %v119_v8  ;;  %v455_v8 = vld [vmem:[%s746_s4] ss:$0 sm:$0xff] }
  0x25   :  { %239 = vmatpush.msra.mxu1 %v224_v43  ;;  %338 = vmatpush.msra.mxu2 %v329_v15  ;;  %v324_v43 = vld [vmem:[#allocation8 + $0x40] sm:$0xff] }
  0x26   :  { %141 = vmatpush.msra.mxu0 %v118_v9  ;;  %437 = vmatpush.msra.mxu3 %v118_v9 }
  0x27   :  { %240 = vmatpush.msra.mxu1 %v223_v44  ;;  %339 = vmatpush.msra.mxu2 %v328_v40  ;;  %v323_v44 = vld [vmem:[#allocation8 + $0x38] sm:$0xff] }
  0x28   :  { %142 = vmatpush.msra.mxu0 %v117_v10  ;;  %438 = vmatpush.msra.mxu3 %v117_v10 }
  0x29   :  { %241 = vmatpush.msra.mxu1 %v222_v45  ;;  %v322_v45 = vld [vmem:[#allocation8 + $0x30] sm:$0xff] }
  0x2a   :  { %143 = vmatpush.msra.mxu0 %v116_v11  ;;  %439 = vmatpush.msra.mxu3 %v116_v11 }
  0x2b   :  { %242 = vmatpush.msra.mxu1 %v221_v46  ;;  %v321_v46 = vld [vmem:[#allocation8 + $0x28] sm:$0xff] }
  0x2c   :  { %144 = vmatpush.msra.mxu0 %v115_v13  ;;  %440 = vmatpush.msra.mxu3 %v115_v13 }
  0x2d   :  { %243 = vmatpush.msra.mxu1 %v220_v47  ;;  %v320_v47 = vld [vmem:[#allocation8 + $0x20] sm:$0xff] }
  0x2e   :  { %145 = vmatpush.msra.mxu0 %v114_v14  ;;  %441 = vmatpush.msra.mxu3 %v114_v14 }
  0x2f   :  { %244 = vmatpush.msra.mxu1 %v219_v48  ;;  %v319_v48 = vld [vmem:[#allocation8 + $0x18] sm:$0xff] }
  0x30   :  { %146 = vmatpush.msra.mxu0 %v113_v16  ;;  %442 = vmatpush.msra.mxu3 %v113_v16 }
  0x31   :  { %245 = vmatpush.msra.mxu1 %v218_v49  ;;  %v318_v49 = vld [vmem:[#allocation8 + $0x10] sm:$0xff] }
  0x32   :  { %147 = vmatpush.msra.mxu0 %v112_v19  ;;  %443 = vmatpush.msra.mxu3 %v112_v19 }
  0x33   :  { %422 = vmatmul.msk.f32.vlgmr.msra.gmra.mxu0 %vm106_vm0, %v610_v20  ;;  %423 = vmatmul.msk.f32.vlgmr.msra.gmra.mxu3 %vm107_vm1, %v610_v20 }
  0x34   :  { %246 = vmatpush.msra.mxu1 %v217_v50  ;;  %v317_v50 = vld [vmem:[#allocation8 + $0x8] sm:$0xff] }
  0x36   :  { %247 = vmatpush.msra.mxu1 %v216_v51  ;;  %v316_v51 = vld [vmem:[#allocation8] sm:$0xff] }
  0x38   :  { %248 = vmatpush.msra.mxu1 %v215_v52 }
  0x3a   :  { %249 = vmatpush.msra.mxu1 %v214_v53 }
  0xb0   :  { %v149_v22 = vpop.f32.mrf.mxu0 }
  0xb1   :  { %v150_v23 = vadd.f32 %v453_v21, %v149_v22 }
  0xb3   :  { %157 = vadd.xlane.f32.xlu0 %v150_v23 }
  0xb6   :  { %v152_v24 = vpop.f32.mrf.mxu3 }
  0xb7   :  { %v153_v25 = vadd.f32 %v453_v21, %v152_v24  ;;  %v456_v21 = vld [vmem:[%s748_s6] ss:$0 sm:$0xff] }
  0xbb   :  { %159 = vadd.xlane.f32.xlu0 %v153_v25 }
 0x126   :  { %v158_v27 = vpop.xlane.xlu0 %157 }
 0x127   :  { %v161_v28 = vmul.f32 0.03125, %v158_v27 }
 0x129   :  { %v163_v31 = vsub.f32 %v150_v23, %v161_v28 }
 0x12b   :  { %v168_v32 = vmul.f32 %v424_v30, %v163_v31 }
 0x12d   :  { %v170_v33 = vmul.f32 %v168_v32, %v168_v32 }
 0x12e   :  { %v160_v34 = vpop.xlane.xlu0 %159 }
 0x12f   :  { %v162_v35 = vmul.f32 0.03125, %v160_v34  ;;  %172 = vadd.xlane.f32.xlu1 %v170_v33 }
 0x131   :  { %v164_v36 = vsub.f32 %v153_v25, %v162_v35 }
 0x133   :  { %v706_v37 = vmul.f32 %v424_v30, %v164_v36  ;;  %v425_v30 = vsel %vm267_vm9, 1.0, %v611_v29  ;;  %v327_v29 = vld [vmem:[#allocation8 + $0x58] sm:$0xff] }
 0x134   :  { %340 = vmatpush.msra.mxu2 %v327_v29 }
 0x135   :  { %v171_v38 = vmul.f32 %v706_v37, %v706_v37 }
 0x136   :  { %341 = vmatpush.msra.mxu2 %v326_v41 }
 0x137   :  { %174 = vadd.xlane.f32.xlu1 %v171_v38 }
 0x138   :  { %342 = vmatpush.msra.mxu2 %v325_v42 }
 0x13a   :  { %343 = vmatpush.msra.mxu2 %v324_v43 }
 0x13c   :  { %344 = vmatpush.msra.mxu2 %v323_v44 }
 0x13e   :  { %345 = vmatpush.msra.mxu2 %v322_v45 }
 0x140   :  { %346 = vmatpush.msra.mxu2 %v321_v46 }
 0x142   :  { %347 = vmatpush.msra.mxu2 %v320_v47 }
 0x144   :  { %348 = vmatpush.msra.mxu2 %v319_v48 }
 0x146   :  { %349 = vmatpush.msra.mxu2 %v318_v49 }
 0x148   :  { %350 = vmatpush.msra.mxu2 %v317_v50 }
 0x14a   :  { %351 = vmatpush.msra.mxu2 %v316_v51 }
 0x1a2   :  { %v173_v54 = vpop.xlane.xlu1 %172 }
 0x1a3   :  { %v176_v55 = vmul.f32 0.03125, %v173_v54 }
 0x1a5   :  { %v178_v56 = vadd.f32 1e-05, %v176_v55 }
 0x1a7   :  { %460 = vrsqrt.f32 %v178_v56  ;;  %vm186_vm4 = vweird.f32 %v178_v56 }
 0x1aa   :  { %v175_v57 = vpop.xlane.xlu1 %174 }
 0x1ab   :  { %v177_v58 = vmul.f32 0.03125, %v175_v57 }
 0x1ad   :  { %v461_v59 = vpop.eup %460  ;;  %v179_v60 = vadd.f32 1e-05, %v177_v58 }
 0x1ae   :  { %v181_v61 = vmul.f32 %v461_v59, %v178_v56  ;;  %vm187_vm3 = vweird.f32 %v461_v59 }
 0x1af   :  { %462 = vrsqrt.f32 %v179_v60  ;;  %vm188_vm5 = vmor %vm186_vm4, %vm187_vm3  ;;  %vm196_vm7 = vweird.f32 %v179_v60 }
 0x1b0   :  { %v182_v62 = vmul.f32 %v461_v59, %v181_v61 }
 0x1b2   :  { %v183_v63 = vmul.f32 0.5, %v182_v62 }
 0x1b4   :  { %v184_v0 = vsub.f32 1.5, %v183_v63 }
 0x1b5   :  { %v463_v1 = vpop.eup %462 }
 0x1b6   :  { %v185_v2 = vmul.f32 %v461_v59, %v184_v0  ;;  %v191_v3 = vmul.f32 %v463_v1, %v179_v60  ;;  %vm197_vm6 = vweird.f32 %v463_v1 }
 0x1b7   :  { %vm198_vm8 = vmor %vm196_vm7, %vm197_vm6 }
 0x1b8   :  { %v192_v5 = vmul.f32 %v463_v1, %v191_v3  ;;  %v189_v6 = vsel %vm188_vm5, %v461_v59, %v185_v2  ;;  %v457_v2 = vld [vmem:[%s749_s7] ss:$0 sm:$0xff] }
 0x1b9   :  { %v200_v7 = vmul.f32 %v189_v6, %v168_v32  ;;  %v458_v6 = vld [vmem:[%s750_s8] ss:$0 sm:$0xff]  ;;  %s612_s8 = smov [#allocation10]  }
 0x1ba   :  { %v193_v9 = vmul.f32 0.5, %v192_v5 }
 0x1bb   :  { %v205_v10 = vmul.f32 %v454_v4, %v200_v7 }
 0x1bc   :  { %v194_v11 = vsub.f32 1.5, %v193_v9 }
 0x1bd   :  { %v210_v12 = vadd.f32 %v455_v8, %v205_v10 }
 0x1be   :  { %v195_v13 = vmul.f32 %v463_v1, %v194_v11 }
 0x1bf   :  { %v212_v14 = vmax.f32 %v210_v12, 0.0 }
 0x1c0   :  { %v199_v16 = vsel %vm198_vm8, %v463_v1, %v195_v13 }
 0x1c1   :  { %250 = vmatmul.f32.vlgmr.msra.gmra.mxu1 %v212_v14  ;;  %v201_v17 = vmul.f32 %v199_v16, %v706_v37 }
 0x1c3   :  { %v206_v18 = vmul.f32 %v454_v4, %v201_v17 }
 0x1c5   :  { %v211_v19 = vadd.f32 %v455_v8, %v206_v18 }
 0x1c7   :  { %v213_v20 = vmax.f32 %v211_v19, 0.0  ;;  %v459_v19 = vld [vmem:[%s752_s10] ss:$0 sm:$0xff]  ;;  %s403_s10 = sshll.u32 %s612_s8, 4  ;;  %s404_s10 = int_to_ptr.vmem [resolvable:$true] %s403_s10 }
 0x1c9   :  { %253 = vmatmul.f32.gmra.mxu1 %v213_v20 }
 0x23e   :  { %v251_v22 = vpop.f32.mrf.mxu1 }
 0x23f   :  { %v252_v23 = vadd.f32 %v456_v21, %v251_v22 }
 0x241   :  { %259 = vadd.xlane.f32.xlu2 %v252_v23 }
 0x246   :  { %v254_v24 = vpop.f32.mrf.mxu1 }
 0x247   :  { %v255_v25 = vadd.f32 %v456_v21, %v254_v24 }
 0x249   :  { %261 = vadd.xlane.f32.xlu2 %v255_v25 }
 0x2b4   :  { %v260_v27 = vpop.xlane.xlu2 %259 }
 0x2b5   :  { %v263_v28 = vmul.f32 0.0625, %v260_v27 }
 0x2b7   :  { %v265_v31 = vsub.f32 %v252_v23, %v263_v28 }
 0x2b9   :  { %v270_v32 = vmul.f32 %v425_v30, %v265_v31 }
 0x2bb   :  { %v272_v33 = vmul.f32 %v270_v32, %v270_v32 }
 0x2bc   :  { %v262_v34 = vpop.xlane.xlu2 %261 }
 0x2bd   :  { %v264_v35 = vmul.f32 0.0625, %v262_v34  ;;  %274 = vadd.xlane.f32.xlu0 %v272_v33 }
 0x2bf   :  { %v266_v36 = vsub.f32 %v255_v25, %v264_v35 }
 0x2c1   :  { %v722_v37 = vmul.f32 %v425_v30, %v266_v36 }
 0x2c3   :  { %v273_v38 = vmul.f32 %v722_v37, %v722_v37 }
 0x2c5   :  { %276 = vadd.xlane.f32.xlu1 %v273_v38 }
 0x330   :  { %v275_v52 = vpop.xlane.xlu0 %274 }
 0x331   :  { %v278_v53 = vmul.f32 0.0625, %v275_v52 }
 0x333   :  { %v280_v54 = vadd.f32 1e-05, %v278_v53 }
 0x335   :  { %464 = vrsqrt.f32 %v280_v54  ;;  %vm288_vm11 = vweird.f32 %v280_v54 }
 0x338   :  { %v277_v55 = vpop.xlane.xlu1 %276 }
 0x339   :  { %v279_v56 = vmul.f32 0.0625, %v277_v55 }
 0x33b   :  { %v465_v57 = vpop.eup %464  ;;  %v281_v58 = vadd.f32 1e-05, %v279_v56 }
 0x33c   :  { %v283_v59 = vmul.f32 %v465_v57, %v280_v54  ;;  %vm289_vm10 = vweird.f32 %v465_v57 }
 0x33d   :  { %466 = vrsqrt.f32 %v281_v58  ;;  %vm290_vm12 = vmor %vm288_vm11, %vm289_vm10  ;;  %vm298_vm14 = vweird.f32 %v281_v58 }
 0x33e   :  { %v284_v60 = vmul.f32 %v465_v57, %v283_v59 }
 0x340   :  { %v285_v61 = vmul.f32 0.5, %v284_v60 }
 0x342   :  { %v286_v62 = vsub.f32 1.5, %v285_v61 }
 0x343   :  { %v467_v63 = vpop.eup %466 }
 0x344   :  { %v287_v0 = vmul.f32 %v465_v57, %v286_v62  ;;  %v293_v1 = vmul.f32 %v467_v63, %v281_v58  ;;  %vm299_vm13 = vweird.f32 %v467_v63 }
 0x345   :  { %vm300_vm15 = vmor %vm298_vm14, %vm299_vm13 }
 0x346   :  { %v294_v3 = vmul.f32 %v467_v63, %v293_v1  ;;  %v291_v4 = vsel %vm290_vm12, %v465_v57, %v287_v0 }
 0x347   :  { %v302_v5 = vmul.f32 %v291_v4, %v270_v32 }
 0x348   :  { %v295_v7 = vmul.f32 0.5, %v294_v3 }
 0x349   :  { %v307_v8 = vmul.f32 %v457_v2, %v302_v5 }
 0x34a   :  { %v296_v9 = vsub.f32 1.5, %v295_v7 }
 0x34b   :  { %v312_v10 = vadd.f32 %v458_v6, %v307_v8 }
 0x34c   :  { %v297_v11 = vmul.f32 %v467_v63, %v296_v9 }
 0x34d   :  { %v314_v12 = vmax.f32 %v312_v10, 0.0 }
 0x34e   :  { %v301_v13 = vsel %vm300_vm15, %v467_v63, %v297_v11 }
 0x34f   :  { %352 = vmatmul.f32.vlgmr.msra.gmra.mxu2 %v314_v12  ;;  %v303_v14 = vmul.f32 %v301_v13, %v722_v37 }
 0x351   :  { %v308_v16 = vmul.f32 %v457_v2, %v303_v14 }
 0x353   :  { %v313_v17 = vadd.f32 %v458_v6, %v308_v16 }
 0x355   :  { %v315_v18 = vmax.f32 %v313_v17, 0.0 }
 0x357   :  { %355 = vmatmul.f32.gmra.mxu2 %v315_v18 }
 0x3d2   :  { %v353_v20 = vpop.f32.mrf.mxu2 }
 0x3d3   :  { %v354_v21 = vadd.f32 %v459_v19, %v353_v20 }
 0x3d5   :  { %v426_v22 = vmul.f32 -1.442695, %v354_v21 }
 0x3d7   :  { %468 = vpow2.f32 %v426_v22 }
 0x3da   :  { %v356_v23 = vpop.f32.mrf.mxu2 }
 0x3db   :  { %v357_v24 = vadd.f32 %v459_v19, %v356_v23 }
 0x3dd   :  { %v469_v25 = vpop.eup %468  ;;  %v427_v26 = vmul.f32 -1.442695, %v357_v24 }
 0x3de   :  { %v365_v27 = vadd.f32 1.0, %v469_v25 }
 0x3df   :  { %470 = vpow2.f32 %v427_v26 }
 0x3e0   :  { %472 = vrcp.f32 %v365_v27  ;;  %v378_v34 = vand.u32 2147483648, %v365_v27  ;;  %v376_v36 = vand.u32 2147483647, %v365_v27  ;;  %vm372_vm1 = vweird.f32 %v365_v27 }
 0x3e2   :  { %v379_v39 = vor.u32 1.1754944e-38, %v378_v34  ;;  %vm377_vm3 = vcmp.eq.f32.partialorder %v376_v36, 8.507059e+37 }
 0x3e5   :  { %v471_v28 = vpop.eup %470 }
 0x3e6   :  { %v473_v30 = vpop.eup %472  ;;  %v366_v31 = vadd.f32 1.0, %v471_v28 }
 0x3e7   :  { %v368_v32 = vmul.f32 %v473_v30, %v365_v27  ;;  %vm373_vm0 = vweird.f32 %v473_v30 }
 0x3e8   :  { %474 = vrcp.f32 %v366_v31  ;;  %vm374_vm2 = vmor %vm372_vm1, %vm373_vm0  ;;  %v393_v42 = vand.u32 2147483648, %v366_v31  ;;  %v391_v44 = vand.u32 2147483647, %v366_v31  ;;  %vm387_vm5 = vweird.f32 %v366_v31 }
 0x3e9   :  { %v369_v33 = vsub.f32 1.0, %v368_v32 }
 0x3ea   :  { %v394_v46 = vor.u32 1.1754944e-38, %v393_v42  ;;  %vm392_vm7 = vcmp.eq.f32.partialorder %v391_v44, 8.507059e+37 }
 0x3eb   :  { %v370_v35 = vmul.f32 %v473_v30, %v369_v33 }
 0x3ed   :  { %v371_v37 = vadd.f32 %v473_v30, %v370_v35 }
 0x3ee   :  { %v475_v38 = vpop.eup %474 }
 0x3ef   :  { %v383_v15 = vmul.f32 %v475_v38, %v366_v31  ;;  %v375_v40 = vsel %vm374_vm2, %v473_v30, %v371_v37  ;;  %vm388_vm4 = vweird.f32 %v475_v38 }
 0x3f0   :  { %v380_v29 = vsel %vm377_vm3, %v379_v39, %v375_v40  ;;  %vm389_vm6 = vmor %vm387_vm5, %vm388_vm4 }
 0x3f1   :  { %v384_v41 = vsub.f32 1.0, %v383_v15  ;;  %397 = vst [vmem:[#allocation10] sm:$0xff] %v380_v29 }
 0x3f3   :  { %v385_v43 = vmul.f32 %v475_v38, %v384_v41 }
 0x3f5   :  { %v386_v45 = vadd.f32 %v475_v38, %v385_v43 }
 0x3f7   :  { %v390_v47 = vsel %vm389_vm6, %v475_v38, %v386_v45 }
 0x3f8   :  { %v395_v48 = vsel %vm392_vm7, %v394_v46, %v390_v47 }
 0x3f9   :  { %398 = vst [vmem:[#allocation10 + $0x8] sm:$0xff] %v395_v48 }
 0x3fa   :  { %411 = dma.vmem_to_hbm [thread:$0]  %s404_s10, 256, %s406_s29, [#allocation4], %s605_s25, %s605_s25, %s606_s26  }
 0x3fb   :  { %602 = dma.done.wait [#allocation4], 256  }
 0x3fc   :  { %603 = vsyncadd [#allocation4], 4294967040 }
 0x3fd   :  { %416 = vsyncpa [#allocation3], 1 }
 0x3fe   :  { %417 = vsyncpa [#allocation6], 1 }
 0x3ff   :  { %418 = vsyncpa [#allocation9], 1 }
 0x400   :  { %419 = vsyncpa [#allocation4], 1 }

</bundles_post_ra>
